<compile_context>
chip_gen: v7x
topology: tpu7x:2x2x1
jax: 0.10.0
libtpu: 0.0.40
codegen_flags: <defaults>
</compile_context>

<pallas_src>
import functools

import jax
import jax.numpy as jnp
from jax import lax
from jax.experimental import pallas as pl
from jax.experimental.pallas import tpu as pltpu


def _cdiv(a, b):
    return (a + b - 1) // b


def _round_up(a, m):
    return _cdiv(a, m) * m


def _vmem_budget_bytes():
    """~80% of the physical per-core VMEM (generation aware)."""
    cap = None
    try:
        cap = int(pltpu.get_tpu_info().vmem_capacity_bytes)
    except Exception:
        cap = None
    if not cap or cap <= 0:
        kind = ""
        try:
            kind = jax.devices()[0].device_kind.lower()
        except Exception:
            pass
        if "v7" in kind:
            cap = 64 << 20                      # v7x: 64 MiB per TensorCore
        elif any(v in kind for v in ("v4", "v5", "v6")):
            cap = 128 << 20                     # v4/v5e/v5p/v6e: 128 MiB
        elif any(v in kind for v in ("v2", "v3")):
            cap = 16 << 20
        else:
            cap = 32 << 20                      # unknown: stay conservative
    return max(12 << 20, int(cap * 0.8))


# ---------------------------------------------------------------------------
# Tiled pass 1: accumulate the partial Gram matrix directly into the resident
# (C, C) output block across the (arbitrary) tile axis.
# ---------------------------------------------------------------------------
def _gram_kernel(x_ref, g_ref, *, matmul_dtype):
    k = pl.program_id(2)

    @pl.when(k == 0)
    def _():
        g_ref[...] = jnp.zeros_like(g_ref)

    x = x_ref[0]                                        # (C, tile_n)
    if matmul_dtype is not None:
        x = x.astype(matmul_dtype)
    # x @ x^T, contracting the lane (N) axis; f32 accumulation on the MXU.
    g_ref[0] += lax.dot_general(
        x, x, (((1,), (1,)), ((), ())), preferred_element_type=jnp.float32)


# ---------------------------------------------------------------------------
# Tiled pass 2: out_tile = P @ x_tile + x_tile (gamma already folded into P).
# ---------------------------------------------------------------------------
def _apply_kernel(p_ref, x_ref, o_ref, *, matmul_dtype):
    x = x_ref[0]                                        # (C, tile_n)
    md = jnp.dtype(matmul_dtype) if matmul_dtype is not None else x.dtype
    p = p_ref[0].astype(md)                             # (C, C)
    xm = x if x.dtype == md else x.astype(md)
    w = jnp.dot(p, xm, preferred_element_type=jnp.float32)
    o_ref[0] = (w + x.astype(jnp.float32)).astype(o_ref.dtype)


# ---------------------------------------------------------------------------
# Resident single-pass kernel: whole (C, N) slab stays in VMEM.
# ---------------------------------------------------------------------------
def _resident_kernel(gamma_ref, x_ref, o_ref, *, matmul_dtype):
    x = x_ref[0]                                        # (C, Np)
    xm = x if matmul_dtype is None else x.astype(matmul_dtype)
    g = lax.dot_general(xm, xm, (((1,), (1,)), ((), ())),
                        preferred_element_type=jnp.float32)       # (C, C)
    aff = jnp.dot(g, g, preferred_element_type=jnp.float32)
    aff_new = jnp.max(aff, axis=-1, keepdims=True) - aff
    m = jnp.max(aff_new, axis=-1, keepdims=True)
    e = jnp.exp(aff_new - m)
    p = gamma_ref[0] * (e / jnp.sum(e, axis=-1, keepdims=True))   # exact softmax
    w = jnp.dot(p.astype(xm.dtype), xm, preferred_element_type=jnp.float32)
    o_ref[0] = (w + x.astype(jnp.float32)).astype(o_ref.dtype)


def channel_attention_block_3d(x, gamma, *, matmul_dtype=None, tile_n=None,
                               path=None):
    """ChannelAttentionBlock3d forward.

    x:     (B, C, H, W, D);  gamma: scalar parameter (init 0 in the module).
    matmul_dtype: optionally run the two N-sized matmuls with lower-precision
        operands (e.g. jnp.bfloat16) while keeping f32 accumulation, the G@G
        product, softmax and epilogue in f32.  Default keeps exact f32.
    tile_n: override the streamed tile width (multiple of 128).
    path:   None (auto) | "resident" | "tiled".
    """
    B, C, H, W, D = x.shape
    N = H * W * D
    itemsize = jnp.dtype(x.dtype).itemsize
    budget = _vmem_budget_bytes()

    x_flat = x.reshape(B, C, N)
    gamma_vec = jnp.asarray(gamma, jnp.float32).reshape(1)

    # -------------------- resident single-pass path -------------------------
    np_res = _round_up(N, 128)
    # in + out double-buffered plus ~3 f32 (C, Np) temporaries inside the body.
    resident_need = C * np_res * (4 * itemsize + 3 * 4) + 16 * C * C * 4
    if path is None:
        path = "resident" if resident_need <= budget else "tiled"

    if path == "resident":
        xp = x_flat if np_res == N else jnp.pad(
            x_flat, ((0, 0), (0, 0), (0, np_res - N)))
        out = pl.pallas_call(
            functools.partial(_resident_kernel, matmul_dtype=matmul_dtype),
            out_shape=jax.ShapeDtypeStruct((B, C, np_res), x.dtype),
            grid=(B,),
            in_specs=[
                pl.BlockSpec(memory_space=pltpu.MemorySpace.SMEM),   # gamma
                pl.BlockSpec((1, C, np_res), lambda b: (b, 0, 0)),
            ],
            out_specs=pl.BlockSpec((1, C, np_res), lambda b: (b, 0, 0)),
            input_output_aliases={1: 0},
            compiler_params=pltpu.CompilerParams(
                dimension_semantics=("parallel",),
                vmem_limit_bytes=budget,
            ),
        )(gamma_vec, xp)
        return out[:, :, :N].reshape(B, C, H, W, D)

    # -------------------- tiled / streaming two-pass path --------------------
    lane_bytes = C * max(itemsize, 4)          # f32 intermediates bound the tile
    if tile_n is None:
        # Size the tile by bytes: ~6 pipelined (C, tile) buffers in the budget.
        tile_n = max(128, ((budget // 6) // lane_bytes) // 128 * 128)
    assert tile_n % 128 == 0, "tile_n must be a multiple of 128"

    natural_tiles = _cdiv(N, tile_n)
    # Split the reduction axis into two "parallel" shards when B == 1 so both
    # TensorCores of a dual-core chip (v7x) see work; harmless on 1-TC chips.
    num_split = 2 if (B == 1 and natural_tiles >= 2) else 1
    num_tiles = _round_up(natural_tiles, num_split)
    # Redistribute so the padding overhead stays minimal.
    tile_n = min(tile_n, _round_up(_cdiv(N, num_tiles), 128))
    num_tiles = _round_up(_cdiv(N, tile_n), num_split)
    n_pad = tile_n * num_tiles
    kt = num_tiles // num_split

    xp = x_flat if n_pad == N else jnp.pad(
        x_flat, ((0, 0), (0, 0), (0, n_pad - N)))

    # Pass 1: per-(batch, split) partial Gram matrices.
    g_parts = pl.pallas_call(
        functools.partial(_gram_kernel, matmul_dtype=matmul_dtype),
        out_shape=jax.ShapeDtypeStruct((B * num_split, C, C), jnp.float32),
        grid=(B, num_split, kt),
        in_specs=[
            pl.BlockSpec((1, C, tile_n), lambda b, s, k: (b, 0, s * kt + k)),
        ],
        out_specs=pl.BlockSpec((1, C, C),
                               lambda b, s, k: (b * num_split + s, 0, 0)),
        compiler_params=pltpu.CompilerParams(
            dimension_semantics=("parallel", "parallel", "arbitrary"),
            vmem_limit_bytes=budget,
        ),
    )(xp)

    # Tiny (C, C) epilogue in plain JAX (negligible vs the N-sized streaming).
    g = g_parts.reshape(B, num_split, C, C).sum(axis=1)          # (B, C, C)
    aff = jnp.matmul(g, g)
    aff_new = jnp.max(aff, axis=-1, keepdims=True) - aff
    p = gamma_vec[0] * jax.nn.softmax(aff_new, axis=-1)          # gamma folded

    # Pass 2: out = P @ x + x, streamed, fully parallel, aliased onto x.
    out = pl.pallas_call(
        functools.partial(_apply_kernel, matmul_dtype=matmul_dtype),
        out_shape=jax.ShapeDtypeStruct((B, C, n_pad), x.dtype),
        grid=(B, num_tiles),
        in_specs=[
            pl.BlockSpec((1, C, C), lambda b, k: (b, 0, 0)),
            pl.BlockSpec((1, C, tile_n), lambda b, k: (b, 0, k)),
        ],
        out_specs=pl.BlockSpec((1, C, tile_n), lambda b, k: (b, 0, k)),
        input_output_aliases={1: 0},
        compiler_params=pltpu.CompilerParams(
            dimension_semantics=("parallel", "parallel"),
            vmem_limit_bytes=budget,
        ),
    )(p.astype(jnp.float32), xp)

    return out[:, :, :N].reshape(B, C, H, W, D)


def _reference(x, gamma):
    """Pure-JAX reference mirroring the PyTorch forward."""
    B, C, H, W, D = x.shape
    xk = x.reshape(B, C, -1).astype(jnp.float32)       # proj_key / proj_value
    xq = jnp.transpose(xk, (0, 2, 1))                  # proj_query / proj_judge
    a1 = jnp.matmul(xk, xq)
    a2 = jnp.matmul(xk, xq)
    aff = jnp.matmul(a1, a2)
    aff_new = jnp.max(aff, axis=-1, keepdims=True) - aff
    aff_new = jax.nn.softmax(aff_new, axis=-1)
    w = jnp.matmul(aff_new, xk).reshape(B, C, H, W, D)
    return (gamma * w + x.astype(jnp.float32)).astype(x.dtype)


if __name__ == "__main__":
    key = jax.random.PRNGKey(0)
    k1, k2, k3 = jax.random.split(key, 3)

    # 1) Auto dispatch (VMEM-resident single pass at this size).
    B, C, H, W, D = 2, 4, 8, 8, 8                       # N = 512
    x = jax.random.normal(k1, (B, C, H, W, D), dtype=jnp.float32)

    out0 = jax.block_until_ready(jax.jit(channel_attention_block_3d)(x, 0.0))
    assert jnp.allclose(out0, _reference(x, 0.0), atol=1e-3, rtol=1e-3)

    out1 = jax.block_until_ready(jax.jit(channel_attention_block_3d)(x, 0.5))
    assert jnp.allclose(out1, _reference(x, 0.5), atol=2e-3, rtol=2e-3)

    # 2) Forced streaming path: multi-tile Gram accumulation, reduction split
    #    into two parallel shards (B == 1), JAX epilogue, streamed apply.
    x2 = jax.random.normal(k2, (1, 8, 8, 8, 16), dtype=jnp.float32)  # N = 1024
    out2 = jax.block_until_ready(
        jax.jit(lambda a, g: channel_attention_block_3d(
            a, g, path="tiled", tile_n=128))(x2, 0.25))
    assert jnp.allclose(out2, _reference(x2, 0.25), atol=5e-3, rtol=5e-3)

    # 3) Forced streaming path with zero-padding (N = 640 not a tile multiple).
    x3 = jax.random.normal(k3, (1, 8, 8, 8, 10), dtype=jnp.float32)  # N = 640
    out3 = jax.block_until_ready(
        jax.jit(lambda a, g: channel_attention_block_3d(
            a, g, path="tiled", tile_n=256))(x3, 0.3))
    assert jnp.allclose(out3, _reference(x3, 0.3), atol=5e-3, rtol=5e-3)

    print("KERNEL_OK")
</pallas_src>

<mosaic_0001>
module attributes {stable_mosaic.version = 11 : i64} {
  func.func @_resident_kernel(%arg0: i32, %arg1: memref<1xf32, #tpu.memory_space<smem>>, %arg2: memref<1x4x512xf32, #tpu.memory_space<vmem>>, %arg3: memref<1x4x512xf32, #tpu.memory_space<vmem>>) attributes {dimension_semantics = [#tpu.dimension_semantics<parallel>], iteration_bounds = array<i64: 2>, scalar_prefetch = 0 : i64, scratch_operands = 0 : i64, tpu.core_type = #tpu.core_type<tc>, window_params = [{transform_indices = @transform_0, window_bounds = array<i64: 1>}, {transform_indices = @transform_1, window_bounds = array<i64: 1, 4, 512>}, {transform_indices = @transform_2, window_bounds = array<i64: 1, 4, 512>}]} {
    %c0 = arith.constant 0 : index
    %c0_0 = arith.constant 0 : index
    %c0_1 = arith.constant 0 : index
    %0 = vector.load %arg2[%c0, %c0_0, %c0_1] : memref<1x4x512xf32, #tpu.memory_space<vmem>>, vector<1x4x512xf32>
    %1 = vector.shape_cast %0 : vector<1x4x512xf32> to vector<4x512xf32>
    %cst = arith.constant dense<0.000000e+00> : vector<4x4xf32>
    %2 = tpu.matmul %1, %1, %cst {dimension_numbers = #tpu.dot_dimension_numbers<[1], [1], [0], [0], [0, 0, 1, 0], [], []>} : vector<4x512xf32>, vector<4x512xf32>, vector<4x4xf32> -> vector<4x4xf32>
    %cst_2 = arith.constant dense<0.000000e+00> : vector<4x4xf32>
    %3 = tpu.matmul %2, %2, %cst_2 {dimension_numbers = #tpu.dot_dimension_numbers<[1], [0], [0], [1], [0, 0, 1, 1], [], []>} : vector<4x4xf32>, vector<4x4xf32>, vector<4x4xf32> -> vector<4x4xf32>
    %cst_3 = arith.constant dense<0xFF800000> : vector<4xf32>
    %4 = vector.multi_reduction <maximumf>, %3, %cst_3 [1] : vector<4x4xf32> to vector<4xf32>
    %5 = vector.shape_cast %4 : vector<4xf32> to vector<4x1xf32>
    %6 = vector.broadcast %5 : vector<4x1xf32> to vector<4x4xf32>
    %7 = arith.subf %6, %3 : vector<4x4xf32>
    %cst_4 = arith.constant dense<0xFF800000> : vector<4xf32>
    %8 = vector.multi_reduction <maximumf>, %7, %cst_4 [1] : vector<4x4xf32> to vector<4xf32>
    %9 = vector.shape_cast %8 : vector<4xf32> to vector<4x1xf32>
    %10 = vector.broadcast %9 : vector<4x1xf32> to vector<4x4xf32>
    %11 = arith.subf %7, %10 : vector<4x4xf32>
    %12 = math.exp %11 : vector<4x4xf32>
    %c0_5 = arith.constant 0 : index
    %13 = memref.load %arg1[%c0_5] : memref<1xf32, #tpu.memory_space<smem>>
    %cst_6 = arith.constant dense<0.000000e+00> : vector<4xf32>
    %14 = vector.multi_reduction <add>, %12, %cst_6 [1] : vector<4x4xf32> to vector<4xf32>
    %15 = vector.shape_cast %14 : vector<4xf32> to vector<4x1xf32>
    %16 = vector.broadcast %15 : vector<4x1xf32> to vector<4x4xf32>
    %17 = arith.divf %12, %16 : vector<4x4xf32>
    %18 = vector.broadcast %13 : f32 to vector<4x4xf32>
    %19 = arith.mulf %18, %17 : vector<4x4xf32>
    %cst_7 = arith.constant dense<0.000000e+00> : vector<4x512xf32>
    %20 = tpu.matmul %19, %1, %cst_7 {dimension_numbers = #tpu.dot_dimension_numbers<[1], [0], [0], [1], [0, 0, 1, 1], [], []>} : vector<4x4xf32>, vector<4x512xf32>, vector<4x512xf32> -> vector<4x512xf32>
    %21 = arith.addf %20, %1 : vector<4x512xf32>
    %c0_8 = arith.constant 0 : index
    %c0_9 = arith.constant 0 : index
    %c0_10 = arith.constant 0 : index
    %22 = vector.load %arg3[%c0_8, %c0_9, %c0_10] : memref<1x4x512xf32, #tpu.memory_space<vmem>>, vector<1x4x512xf32>
    %23 = vector.shape_cast %22 : vector<1x4x512xf32> to vector<4x512xf32>
    %24 = vector.shape_cast %21 : vector<4x512xf32> to vector<1x4x512xf32>
    tpu.vector_store %arg3[%c0_8, %c0_9, %c0_10], %24 {strides = array<i32>} : memref<1x4x512xf32, #tpu.memory_space<vmem>>, vector<1x4x512xf32>,
    return
  }
  func.func @transform_0(%arg0: i32) -> i32 {
    %c0_i32 = arith.constant 0 : i32
    %c0_i32_0 = arith.constant 0 : i32
    return %c0_i32 : i32
  }
  func.func @transform_1(%arg0: i32) -> (i32, i32, i32) {
    %c0_i32 = arith.constant 0 : i32
    %c0_i32_0 = arith.constant 0 : i32
    %c0_i32_1 = arith.constant 0 : i32
    return %arg0, %c0_i32, %c0_i32_0 : i32, i32, i32
  }
  func.func @transform_2(%arg0: i32) -> (i32, i32, i32) {
    %c0_i32 = arith.constant 0 : i32
    %c0_i32_0 = arith.constant 0 : i32
    %c0_i32_1 = arith.constant 0 : i32
    return %arg0, %c0_i32, %c0_i32_0 : i32, i32, i32
  }
}

</mosaic_0001>

<bundles_post_ra>
// kernel: channel_attention_block_3d.1
= control target key start
LH: loop header
LB: loop body
LE: loop exit
PB: predicated region body
PF: predicated region fallthrough
CT: control target
= control target key end

     0   :  { %s681_s11 = smov 0   ;;  %s713_s0 = inlined_call_operand.<no memory space> [shape: f32[1], index: 0, kind: input, shape index: {}]   ;;  %s714_s1 = inlined_call_operand.vmem [shape: f32[2,4,512], index: 1, kind: input, shape index: {}, may-alias: {1,2}]   ;;  %s715_s2 = inlined_call_operand.vmem [shape: f32[2,4,512], index: 2, kind: output, shape index: {}, may-alias: {1,2}]  }
   0x1   :  { %7 = sst [smem:[#allocation2]] %s713_s0 }
   0x2 LB: > { %s607_s12 = sadd.s32 4294967295, %s659_s11   ;;  %p611_p0 = scmp.ge.s32.totalorder %s659_s11, 1  ;;  %s659_s11 = sphi %s681_s11, %s13_s11  }
   0x3   : > { %p113_p1 = scmp.lt.s32.totalorder %s659_s11, 3 }
   0x5   : > { %p114_p2 = pnand %p611_p0, %p113_p1 }
   0x6   : > { %p135_p3 = scmp.lt.s32.totalorder (!%p114_p2), %s607_s12, 1  ;;  %v661_v4 = vmov (!%p114_p2), 0.0   ;;  %vm662_vm0 = vmmov (!%p114_p2), 0   ;;  %vm297_vm1 = vcmask (!%p114_p2), 1043456   ;;  %vm293_vm2 = vcmask (!%p114_p2), 31744   ;;  %s381_s16 = sld [smem:[#allocation2]] (!%p114_p2) }
   0x7   : > { %117 = sbr.rel (%p114_p2) target bundleno = 1140 (0x474), region = 28  ;;  %630 = vmatprep.subr.mxu1 (!%p114_p2), %v661_v4  ;;  %632 = vmatprep.mubr.msk.f32.mxu1 (!%p114_p2), %vm662_vm0, %v661_v4  ;;  %vm370_vm3 = vcmask (!%p114_p2), 27648  }
   0xc   : > { %v387_v20 = vstv (!%p114_p2), %s381_s16 }
   0xe   : > { %s717_s12 = smov (!%p135_p3, %s607_s12), 1 }
   0xf   : > { %s626_s0 = sshll.u32 %s717_s12, 4 }
  0x10   : > { %s139_s15 = scalar_lea.vmem %s714_s1, %s626_s0  ;;  %s144_s19 = scalar_lea.vmem %s715_s2, %s626_s0 }
  0x11   : > { %v145_v0 = vld [vmem:[%s139_s15] sm:$0xff]  ;;  %v146_v1 = vld [vmem:[%s139_s15 + $0x8] sm:$0xff] }
  0x12   : > { %v149_v2 = vcombine.high %v145_v0, %v145_v0  ;;  %v150_v3 = vcombine.high %v146_v1, %v146_v1 }
  0x14   : > { %153 = vmatprep.subr.mxu0 %v149_v2  ;;  %217 = vmatprep.mubr.f32.mxu0 %v149_v2 }
  0x15   : > { %154 = vmatpush1.xpose.msra.mxu0 %v145_v0 }
  0x16   : > { %223 = vmatprep.subr.mxu0 %v150_v3 }
  0x18   : > { %218 = vmatmul.mubr.f32.vlgmr.msra.gmra.mrb[0].mxu0 %v145_v0 }
  0x19   : > { %224 = vmatpush1.xpose.msra.mxu0 %v146_v1  ;;  %287 = vmatprep.mubr.f32.mxu0 %v150_v3 }
  0x20   : > { %288 = vmatmul.mubr.f32.vlgmr.msra.gmra.mrb[0].mxu0 %v146_v1 }
  0xf3   : > { %v289_v5 = vpop.f32.mrb[0].mxu0 }
  0xf4   : > { %v291_v6 = vpop.f32.mrb[1].mxu0  ;;  %631 = vmatpush3.msk.msra.mxu1 %vm297_vm1, %v289_v5 }
  0xf5   : > { %633 = vmatmul.mubr.msk.f32.vlgmr.msra.gmra.mrb[0].mxu1 %vm293_vm2, %v289_v5  ;;  %618 = vmatprep.subr.msk.mxu1 %vm297_vm1, %v149_v2 }
  0xf6   : > { %619 = vmatpush1.msk.msra.mxu1 %vm297_vm1, %v145_v0  ;;  %464 = vmatprep.mubr.f32.mxu1 %v661_v4 }
  0xf7   : > { %621 = vmatprep.subr.msk.mxu1 %vm297_vm1, %v150_v3 }
 0x1c8   : > { %v366_v7 = vpop.f32.mrb[0].mxu1 }
 0x1c9   : > { %v634_v8 = vpop.f32.mrb[1].mxu1  ;;  %v371_v9 = vsel %vm370_vm3, %v366_v7, -inf }
 0x1ca   : > { %372 = vmax.xlane.f32.xlu0 %v371_v9 }
 0x257   : > { %v373_v10 = vpop.xlane.xlu0 %372 }
 0x258   : > { %v374_v11 = vsub.f32 %v373_v10, %v366_v7 }
 0x25a   : > { %v375_v12 = vsel %vm370_vm3, %v374_v11, -inf }
 0x25b   : > { %376 = vmax.xlane.f32.xlu0 %v375_v12 }
 0x2e8   : > { %v377_v13 = vpop.xlane.xlu0 %376 }
 0x2e9   : > { %v378_v14 = vsub.f32 %v374_v11, %v377_v13 }
 0x2eb   : > { %v379_v15 = vmul.f32 1.442695, %v378_v14 }
 0x2ed   : > { %649 = vpow2.f32 %v379_v15 }
 0x2f7   : > { %v650_v16 = vpop.eup %649 }
 0x2f8   : > { %v382_v17 = vsel %vm370_vm3, %v650_v16, 0.0 }
 0x2f9   : > { %383 = vadd.xlane.f32.xlu1 %v382_v17 }
 0x386   : > { %v384_v18 = vpop.xlane.xlu1 %383 }
 0x387   : > { %651 = vrcp.f32 %v384_v18 }
 0x391   : > { %v652_v19 = vpop.eup %651 }
 0x392   : > { %v386_v21 = vmul.f32 %v652_v19, %v650_v16 }
 0x394   : > { %v388_v22 = vmul.f32 %v387_v20, %v386_v21 }
 0x396   : > { %620 = vmatmul.mubr.msk.f32.vlgmr.msra.gmra.mrb[2].mxu1 %vm293_vm2, %v388_v22 }
 0x397   : > { %622 = vmatpush1.msk.msra.mxu1 %vm297_vm1, %v146_v1  ;;  %535 = vmatprep.mubr.f32.mxu1 %v661_v4 }
 0x39a   : > { %623 = vmatmul.mubr.msk.f32.vlgmr.msra.gmra.mrb[4].mxu1 %vm293_vm2, %v388_v22 }
 0x469   : > { %v466_v23 = vpop.f32.mrb[2].mxu1 }
 0x46a   : > { %v467_v24 = vadd.f32 %v466_v23, %v145_v0  ;;  %v468_v25 = vpop.f32.mrb[3].mxu1 }
 0x46b   : > { %v469_v26 = vadd.f32 %v468_v25, %v149_v2 }
 0x46d   : > { %v546_v27 = vcombine.low %v467_v24, %v469_v26  ;;  %v537_v28 = vpop.f32.mrb[4].mxu1 }
 0x46e   : > { %v538_v29 = vadd.f32 %v537_v28, %v146_v1  ;;  %v539_v30 = vpop.f32.mrb[5].mxu1 }
 0x46f   : > { %550 = vst [vmem:[%s144_s19] sm:$0xff] %v546_v27  ;;  %v540_v31 = vadd.f32 %v539_v30, %v150_v3 }
 0x471   : > { %v547_v32 = vcombine.low %v538_v29, %v540_v31 }
 0x473   : > { %551 = vst [vmem:[%s144_s19 + $0x8] sm:$0xff] %v547_v32 }
 0x474 PF: > { %s13_s11 = sadd.s32 1, %s659_s11  }
 0x475   : > { %p10_p4 = scmp.ge.s32.totalorder %s13_s11, 4  }
 0x477   :  { %12 = sbr.rel (!%p10_p4) target bundleno = 2 (0x2), region = 58 }

</bundles_post_ra>
